<compile_context>
chip_gen: v7x
topology: tpu7x:2x2x1
jax: 0.10.0
libtpu: 0.0.40
codegen_flags: <defaults>
</compile_context>

<pallas_src>
import math

import jax
import jax.numpy as jnp
from jax.experimental import pallas as pl
from jax.experimental.pallas import tpu as pltpu

EPS = 1e-5
IN_DIM = 64 + 256 + 256          # 576
DIMS = [IN_DIM, 128, 64, 32, 16, 8, 4, 2, 1]


def _fnn_kernel(x_ref,
                w12, b12, w34, b34, w56, b56, w78t, b78,
                gb_ref,
                o_ref):
    """One grid step: all B batch rows for a block of TF BatchNorm channels."""
    B, TF, D = x_ref.shape

    def linear(h2, w_ref, b_ref):
        # Matmul in the weights' dtype (bf16 or f32); f32 accumulation + f32 bias add.
        return jnp.dot(h2.astype(w_ref.dtype), w_ref[...],
                       preferred_element_type=jnp.float32) + b_ref[...]

    # Interleaved per-channel BN affine params: [g0 b0 g1 b1 g2 b2] on the lane axis.
    gb = gb_ref[0]                                            # (TF, 6) f32

    def batchnorm(h3, i):
        # Training-mode BN: per-channel biased stats over (batch, feature) = axes (0, 2).
        n = h3.shape[0] * h3.shape[2]
        mu = jnp.sum(jnp.sum(h3, axis=2, keepdims=True),
                     axis=0, keepdims=True) / n                # (1, TF, 1)
        d = h3 - mu                                            # consumed only by the var reduce
        var = jnp.sum(jnp.sum(d * d, axis=2, keepdims=True),
                      axis=0, keepdims=True) / n               # (1, TF, 1)
        gamma = gb[:, 2 * i:2 * i + 1]                         # (TF, 1) sublane slice
        beta = gb[:, 2 * i + 1:2 * i + 2]                      # (TF, 1)
        scale = jax.lax.rsqrt(var + EPS) * gamma               # (1, TF, 1)
        shift = beta - mu * scale                              # (1, TF, 1)
        return h3 * scale + shift                              # single fused normalize pass

    # fc_1∘fc_2 (composed) -> bn1    (576 -> 64, the only HBM-significant matmul)
    h2 = linear(x_ref[...].reshape(B * TF, D), w12, b12)       # (B*TF, 64)
    h3 = batchnorm(h2.reshape(B, TF, 64), 0)
    # fc_3∘fc_4 (composed) -> bn2    (64 -> 16)
    h2 = linear(h3.reshape(B * TF, 64), w34, b34)
    h3 = batchnorm(h2.reshape(B, TF, 16), 1)
    # fc_5∘fc_6 (composed) -> bn3    (16 -> 4)
    h2 = linear(h3.reshape(B * TF, 16), w56, b56)
    h3 = batchnorm(h2.reshape(B, TF, 4), 2)
    # fc_7∘fc_8 (composed, 4 -> 1): VPU multiply + lane reduce (skips a 1-column MXU op).
    out = jnp.sum(h3 * w78t[...].reshape(1, 1, 4), axis=-1) + b78[...]   # (B, TF)
    o_ref[0] = out


def make_params(key, num_features):
    """Deterministic parameters matching PyTorch Linear/BatchNorm shapes.

    Linear weights are stored pre-transposed as (in, out).  BatchNorm1d default
    init is weight=1 / bias=0; we randomize them here so the test exercises the
    affine path (the forward formula is identical either way).
    """
    params = {"weights": [], "biases": []}
    for i in range(8):
        fan_in = DIMS[i]
        key, kw, kb = jax.random.split(key, 3)
        bound = 1.0 / math.sqrt(fan_in)
        w = jax.random.uniform(kw, (fan_in, DIMS[i + 1]), jnp.float32, -bound, bound)
        b = jax.random.uniform(kb, (DIMS[i + 1],), jnp.float32, -bound, bound)
        params["weights"].append(w)
        params["biases"].append(b)
    kg = jax.random.split(key, 6)
    params["bn_gamma"] = [
        jax.random.uniform(kg[i], (num_features,), jnp.float32, 0.5, 1.5)
        for i in range(3)]
    params["bn_beta"] = [
        jax.random.uniform(kg[3 + i], (num_features,), jnp.float32, -0.5, 0.5)
        for i in range(3)]
    return params


def _compose_pair(w_a, b_a, w_b, b_b):
    # y = (x @ Wa + ba) @ Wb + bb  ==  x @ (Wa@Wb) + (ba@Wb + bb)
    # Exact algebraically: there is no nonlinearity between the paired Linears.
    return w_a @ w_b, b_a @ w_b + b_b


def _pick_channel_block(B, F, itemsize, *, target_step_bytes=2 << 20,
                        x_vmem_budget=24 << 20, min_steps=4):
    """Channel-block TF (multiple of 8), aware of B, dtype and the VMEM budget.

    Targets ~2 MiB of x per grid step and >= `min_steps` steps so the input DMA
    pipelines against compute (and both v7x TensorCores are used via the parallel
    grid axis).  Tiny F degrades gracefully to fewer steps.
    """
    row_bytes = B * IN_DIM * itemsize                  # one channel's x slab
    tf = (target_step_bytes // row_bytes) // 8 * 8     # ~2 MiB of x per step
    tf = min(tf, (F // min_steps) // 8 * 8)            # keep >= min_steps steps if F allows
    tf = min(tf, (x_vmem_budget // (2 * row_bytes)) // 8 * 8)   # 2 pipeline buffers fit
    fp8 = -(-F // 8) * 8
    return max(8, min(tf, fp8))


def fnn_pallas(x_bfd, params, *, matmul_dtype=jnp.bfloat16, channel_block=None):
    """x_bfd: (B, F, 576) in the PyTorch layout.  Returns (B, F, 1) float32.

    Default path streams x and the MXU weights in bf16 (f32 accumulation, f32 BN);
    pass matmul_dtype=jnp.float32 for an exact-ish reference path.
    """
    B, F, D = x_bfd.shape
    assert D == IN_DIM
    itemsize = jnp.dtype(matmul_dtype).itemsize

    TF = channel_block if channel_block is not None else _pick_channel_block(B, F, itemsize)
    assert TF % 8 == 0, "channel block must be a multiple of 8"
    G = -(-F // TF)                                    # grid steps
    Fp = G * TF

    # bf16 (or f32) activation stream.  TODO(synk): in the full IGNNet the upstream
    # GNN should emit bf16 directly so this cast fuses into the producer.
    x = x_bfd.astype(matmul_dtype)
    if Fp != F:
        # Zero-pad the channel axis: BN is per-channel, so padded channels never
        # affect real channels' statistics; their outputs are sliced off below.
        x = jnp.pad(x, ((0, 0), (0, Fp - F), (0, 0)))

    ws, bs = params["weights"], params["biases"]
    w12, b12 = _compose_pair(ws[0], bs[0], ws[1], bs[1])   # (576, 64), (64,)
    w34, b34 = _compose_pair(ws[2], bs[2], ws[3], bs[3])   # (64, 16),  (16,)
    w56, b56 = _compose_pair(ws[4], bs[4], ws[5], bs[5])   # (16, 4),   (4,)
    w78, b78 = _compose_pair(ws[6], bs[6], ws[7], bs[7])   # (4, 1),    (1,)

    w12 = w12.astype(matmul_dtype)
    w34 = w34.astype(matmul_dtype)
    w56 = w56.astype(matmul_dtype)
    w78t = w78.T.astype(jnp.float32)                       # (1, 4), consumed on the VPU
    b12 = b12.reshape(1, -1).astype(jnp.float32)
    b34 = b34.reshape(1, -1).astype(jnp.float32)
    b56 = b56.reshape(1, -1).astype(jnp.float32)
    b78 = b78.reshape(1, 1).astype(jnp.float32)

    # gamma/beta interleaved per channel: (G, TF, 6) -> one contiguous DMA per step,
    # consumed in-kernel as (TF, 1) sublane slices (no relayout).
    gamma = jnp.stack(params["bn_gamma"]).astype(jnp.float32)   # (3, F)
    beta = jnp.stack(params["bn_beta"]).astype(jnp.float32)     # (3, F)
    gb = jnp.zeros((Fp, 6), jnp.float32)
    gb = gb.at[:F, 0::2].set(gamma.T)
    gb = gb.at[:F, 1::2].set(beta.T)
    gb = gb.reshape(G, TF, 6)

    def full_spec(shape):
        return pl.BlockSpec(shape, lambda f, _s=shape: (0,) * len(_s))

    in_specs = [
        pl.BlockSpec((B, TF, D), lambda f: (0, f, 0)),     # x tile: all batch, TF channels
        full_spec(w12.shape), full_spec(b12.shape),
        full_spec(w34.shape), full_spec(b34.shape),
        full_spec(w56.shape), full_spec(b56.shape),
        full_spec(w78t.shape), full_spec(b78.shape),
        pl.BlockSpec((1, TF, 6), lambda f: (f, 0, 0)),     # interleaved gamma/beta
    ]

    out3d = pl.pallas_call(
        _fnn_kernel,
        out_shape=jax.ShapeDtypeStruct((G, B, TF), jnp.float32),
        grid_spec=pltpu.PrefetchScalarGridSpec(
            num_scalar_prefetch=0,
            grid=(G,),
            in_specs=in_specs,
            # Block equals the full (B, TF) trailing dims -> legal for any TF.
            out_specs=pl.BlockSpec((1, B, TF), lambda f: (f, 0, 0)),
        ),
        compiler_params=pltpu.CompilerParams(
            dimension_semantics=("parallel",),
            # 48 MiB: well under v7x's 64 MiB/TC physical VMEM, above the 32 MiB
            # default so the ~2 MiB/step x tiles double-buffer with headroom.
            vmem_limit_bytes=48 * 1024 * 1024,
        ),
    )(x, w12, b12, w34, b34, w56, b56, w78t, b78, gb)

    out = jnp.transpose(out3d, (1, 0, 2)).reshape(B, Fp)[:, :F]
    return out[:, :, None]                                 # (B, F, 1), PyTorch layout


def fnn_reference(x, params):
    """Pure-JAX reference of the PyTorch forward (training-mode BN, 8 separate Linears)."""
    def lin(h, i):
        return h @ params["weights"][i] + params["biases"][i]

    def bn(h, i):
        mu = jnp.mean(h, axis=(0, 2), keepdims=True)
        var = jnp.mean((h - mu) ** 2, axis=(0, 2), keepdims=True)
        g = params["bn_gamma"][i].reshape(1, -1, 1)
        be = params["bn_beta"][i].reshape(1, -1, 1)
        return (h - mu) * jax.lax.rsqrt(var + EPS) * g + be

    h = bn(lin(lin(x, 0), 1), 0)
    h = bn(lin(lin(h, 2), 3), 1)
    h = bn(lin(lin(h, 4), 5), 2)
    h = lin(lin(h, 6), 7)
    return h


if __name__ == "__main__":
    key = jax.random.PRNGKey(0)

    # Case 1: B=4, F=32  -> TF=8, grid=(4,): pipelined steps, both v7x cores usable.
    B, F = 4, 32
    kx, kp, krest = jax.random.split(key, 3)
    x = jax.random.normal(kx, (B, F, IN_DIM), jnp.float32)
    params = make_params(kp, F)
    ref = jax.block_until_ready(fnn_reference(x, params))

    # f32 matmul path: tight check (only diff vs the PyTorch-equivalent reference is
    # float reassociation from composing Linear pairs / fusing the BN normalize).
    out_f32 = jax.block_until_ready(fnn_pallas(x, params, matmul_dtype=jnp.float32))
    assert out_f32.shape == (B, F, 1), out_f32.shape
    assert jnp.allclose(out_f32, ref, rtol=1e-3, atol=1e-3), (
        float(jnp.max(jnp.abs(out_f32 - ref))))

    # bf16 fast path (default): bf16 x stream + bf16 MXU weights, f32 acc + f32 BN.
    # Looser tolerance: bf16 rounding accumulates through three training-mode BNs.
    out_bf16 = jax.block_until_ready(fnn_pallas(x, params))
    assert out_bf16.shape == (B, F, 1), out_bf16.shape
    assert jnp.allclose(out_bf16, ref, rtol=2e-1, atol=2e-1), (
        float(jnp.max(jnp.abs(out_bf16 - ref))))

    # Case 2: F not a multiple of 8 exercises the channel zero-padding path (grid=(2,)).
    B2, F2 = 2, 13
    kx2, kp2 = jax.random.split(krest)
    x2 = jax.random.normal(kx2, (B2, F2, IN_DIM), jnp.float32)
    params2 = make_params(kp2, F2)
    ref2 = fnn_reference(x2, params2)
    out2 = jax.block_until_ready(fnn_pallas(x2, params2, matmul_dtype=jnp.float32))
    assert out2.shape == (B2, F2, 1), out2.shape
    assert jnp.allclose(out2, ref2, rtol=1e-3, atol=1e-3), (
        float(jnp.max(jnp.abs(out2 - ref2))))

    print("KERNEL_OK")
</pallas_src>

<mosaic_0001>
module attributes {stable_mosaic.version = 11 : i64} {
  func.func @_fnn_kernel(%arg0: i32, %arg1: memref<4x8x576xf32, #tpu.memory_space<vmem>>, %arg2: memref<576x64xf32, #tpu.memory_space<vmem>>, %arg3: memref<1x64xf32, #tpu.memory_space<vmem>>, %arg4: memref<64x16xf32, #tpu.memory_space<vmem>>, %arg5: memref<1x16xf32, #tpu.memory_space<vmem>>, %arg6: memref<16x4xf32, #tpu.memory_space<vmem>>, %arg7: memref<1x4xf32, #tpu.memory_space<vmem>>, %arg8: memref<1x4xf32, #tpu.memory_space<vmem>>, %arg9: memref<1x1xf32, #tpu.memory_space<vmem>>, %arg10: memref<1x8x6xf32, #tpu.memory_space<vmem>>, %arg11: memref<1x4x8xf32, #tpu.memory_space<vmem>>) attributes {dimension_semantics = [#tpu.dimension_semantics<parallel>], iteration_bounds = array<i64: 4>, scalar_prefetch = 0 : i64, scratch_operands = 0 : i64, tpu.core_type = #tpu.core_type<tc>, window_params = [{transform_indices = @transform_0, window_bounds = array<i64: 4, 8, 576>}, {pipeline_mode = #tpu.pipeline_mode<synchronous>, transform_indices = @transform_1, window_bounds = array<i64: 576, 64>}, {pipeline_mode = #tpu.pipeline_mode<synchronous>, transform_indices = @transform_2, window_bounds = array<i64: 1, 64>}, {pipeline_mode = #tpu.pipeline_mode<synchronous>, transform_indices = @transform_3, window_bounds = array<i64: 64, 16>}, {pipeline_mode = #tpu.pipeline_mode<synchronous>, transform_indices = @transform_4, window_bounds = array<i64: 1, 16>}, {pipeline_mode = #tpu.pipeline_mode<synchronous>, transform_indices = @transform_5, window_bounds = array<i64: 16, 4>}, {pipeline_mode = #tpu.pipeline_mode<synchronous>, transform_indices = @transform_6, window_bounds = array<i64: 1, 4>}, {pipeline_mode = #tpu.pipeline_mode<synchronous>, transform_indices = @transform_7, window_bounds = array<i64: 1, 4>}, {pipeline_mode = #tpu.pipeline_mode<synchronous>, transform_indices = @transform_8, window_bounds = array<i64: 1, 1>}, {transform_indices = @transform_9, window_bounds = array<i64: 1, 8, 6>}, {transform_indices = @transform_10, window_bounds = array<i64: 1, 4, 8>}]} {
    %c0 = arith.constant 0 : index
    %c0_0 = arith.constant 0 : index
    %c0_1 = arith.constant 0 : index
    %0 = vector.load %arg10[%c0, %c0_0, %c0_1] : memref<1x8x6xf32, #tpu.memory_space<vmem>>, vector<1x8x6xf32>
    %1 = vector.shape_cast %0 : vector<1x8x6xf32> to vector<8x6xf32>
    %c0_2 = arith.constant 0 : index
    %c0_3 = arith.constant 0 : index
    %c0_4 = arith.constant 0 : index
    %2 = vector.load %arg1[%c0_2, %c0_3, %c0_4] : memref<4x8x576xf32, #tpu.memory_space<vmem>>, vector<4x8x576xf32>
    %3 = vector.shape_cast %2 : vector<4x8x576xf32> to vector<32x576xf32>
    %c0_5 = arith.constant 0 : index
    %c0_6 = arith.constant 0 : index
    %4 = vector.load %arg2[%c0_5, %c0_6] : memref<576x64xf32, #tpu.memory_space<vmem>>, vector<576x64xf32>
    %cst = arith.constant dense<0.000000e+00> : vector<32x64xf32>
    %5 = tpu.matmul %3, %4, %cst {dimension_numbers = #tpu.dot_dimension_numbers<[1], [0], [0], [1], [0, 0, 1, 1], [], []>} : vector<32x576xf32>, vector<576x64xf32>, vector<32x64xf32> -> vector<32x64xf32>
    %c0_7 = arith.constant 0 : index
    %c0_8 = arith.constant 0 : index
    %6 = vector.load %arg3[%c0_7, %c0_8] : memref<1x64xf32, #tpu.memory_space<vmem>>, vector<1x64xf32>
    %7 = vector.broadcast %6 : vector<1x64xf32> to vector<32x64xf32>
    %8 = arith.addf %5, %7 : vector<32x64xf32>
    %9 = vector.shape_cast %8 : vector<32x64xf32> to vector<4x8x64xf32>
    %cst_9 = arith.constant dense<0.000000e+00> : vector<4x8xf32>
    %10 = vector.multi_reduction <add>, %9, %cst_9 [2] : vector<4x8x64xf32> to vector<4x8xf32>
    %11 = vector.shape_cast %10 : vector<4x8xf32> to vector<4x8x1xf32>
    %cst_10 = arith.constant dense<0.000000e+00> : vector<8x1xf32>
    %12 = vector.multi_reduction <add>, %11, %cst_10 [0] : vector<4x8x1xf32> to vector<8x1xf32>
    %13 = vector.shape_cast %12 : vector<8x1xf32> to vector<1x8x1xf32>
    %cst_11 = arith.constant 2.560000e+02 : f32
    %14 = vector.broadcast %cst_11 : f32 to vector<1x8x1xf32>
    %15 = arith.divf %13, %14 : vector<1x8x1xf32>
    %16 = vector.broadcast %15 : vector<1x8x1xf32> to vector<4x8x64xf32>
    %17 = arith.subf %9, %16 : vector<4x8x64xf32>
    %18 = arith.mulf %17, %17 : vector<4x8x64xf32>
    %cst_12 = arith.constant dense<0.000000e+00> : vector<4x8xf32>
    %19 = vector.multi_reduction <add>, %18, %cst_12 [2] : vector<4x8x64xf32> to vector<4x8xf32>
    %20 = vector.shape_cast %19 : vector<4x8xf32> to vector<4x8x1xf32>
    %cst_13 = arith.constant dense<0.000000e+00> : vector<8x1xf32>
    %21 = vector.multi_reduction <add>, %20, %cst_13 [0] : vector<4x8x1xf32> to vector<8x1xf32>
    %22 = vector.shape_cast %21 : vector<8x1xf32> to vector<1x8x1xf32>
    %cst_14 = arith.constant 2.560000e+02 : f32
    %23 = vector.broadcast %cst_14 : f32 to vector<1x8x1xf32>
    %24 = arith.divf %22, %23 : vector<1x8x1xf32>
    %25 = vector.extract_strided_slice %1 {offsets = [0, 0], sizes = [8, 1], strides = [1, 1]} : vector<8x6xf32> to vector<8x1xf32>
    %26 = vector.extract_strided_slice %1 {offsets = [0, 1], sizes = [8, 1], strides = [1, 1]} : vector<8x6xf32> to vector<8x1xf32>
    %cst_15 = arith.constant 9.99999974E-6 : f32
    %27 = vector.broadcast %cst_15 : f32 to vector<1x8x1xf32>
    %28 = arith.addf %24, %27 : vector<1x8x1xf32>
    %29 = math.rsqrt %28 : vector<1x8x1xf32>
    %30 = vector.shape_cast %25 : vector<8x1xf32> to vector<1x8x1xf32>
    %31 = arith.mulf %29, %30 : vector<1x8x1xf32>
    %32 = arith.mulf %15, %31 : vector<1x8x1xf32>
    %33 = vector.shape_cast %26 : vector<8x1xf32> to vector<1x8x1xf32>
    %34 = arith.subf %33, %32 : vector<1x8x1xf32>
    %35 = vector.broadcast %31 : vector<1x8x1xf32> to vector<4x8x64xf32>
    %36 = arith.mulf %9, %35 : vector<4x8x64xf32>
    %37 = vector.broadcast %34 : vector<1x8x1xf32> to vector<4x8x64xf32>
    %38 = arith.addf %36, %37 : vector<4x8x64xf32>
    %39 = vector.shape_cast %38 : vector<4x8x64xf32> to vector<32x64xf32>
    %c0_16 = arith.constant 0 : index
    %c0_17 = arith.constant 0 : index
    %40 = vector.load %arg4[%c0_16, %c0_17] : memref<64x16xf32, #tpu.memory_space<vmem>>, vector<64x16xf32>
    %cst_18 = arith.constant dense<0.000000e+00> : vector<32x16xf32>
    %41 = tpu.matmul %39, %40, %cst_18 {dimension_numbers = #tpu.dot_dimension_numbers<[1], [0], [0], [1], [0, 0, 1, 1], [], []>} : vector<32x64xf32>, vector<64x16xf32>, vector<32x16xf32> -> vector<32x16xf32>
    %c0_19 = arith.constant 0 : index
    %c0_20 = arith.constant 0 : index
    %42 = vector.load %arg5[%c0_19, %c0_20] : memref<1x16xf32, #tpu.memory_space<vmem>>, vector<1x16xf32>
    %43 = vector.broadcast %42 : vector<1x16xf32> to vector<32x16xf32>
    %44 = arith.addf %41, %43 : vector<32x16xf32>
    %45 = vector.shape_cast %44 : vector<32x16xf32> to vector<4x8x16xf32>
    %cst_21 = arith.constant dense<0.000000e+00> : vector<4x8xf32>
    %46 = vector.multi_reduction <add>, %45, %cst_21 [2] : vector<4x8x16xf32> to vector<4x8xf32>
    %47 = vector.shape_cast %46 : vector<4x8xf32> to vector<4x8x1xf32>
    %cst_22 = arith.constant dense<0.000000e+00> : vector<8x1xf32>
    %48 = vector.multi_reduction <add>, %47, %cst_22 [0] : vector<4x8x1xf32> to vector<8x1xf32>
    %49 = vector.shape_cast %48 : vector<8x1xf32> to vector<1x8x1xf32>
    %cst_23 = arith.constant 6.400000e+01 : f32
    %50 = vector.broadcast %cst_23 : f32 to vector<1x8x1xf32>
    %51 = arith.divf %49, %50 : vector<1x8x1xf32>
    %52 = vector.broadcast %51 : vector<1x8x1xf32> to vector<4x8x16xf32>
    %53 = arith.subf %45, %52 : vector<4x8x16xf32>
    %54 = arith.mulf %53, %53 : vector<4x8x16xf32>
    %cst_24 = arith.constant dense<0.000000e+00> : vector<4x8xf32>
    %55 = vector.multi_reduction <add>, %54, %cst_24 [2] : vector<4x8x16xf32> to vector<4x8xf32>
    %56 = vector.shape_cast %55 : vector<4x8xf32> to vector<4x8x1xf32>
    %cst_25 = arith.constant dense<0.000000e+00> : vector<8x1xf32>
    %57 = vector.multi_reduction <add>, %56, %cst_25 [0] : vector<4x8x1xf32> to vector<8x1xf32>
    %58 = vector.shape_cast %57 : vector<8x1xf32> to vector<1x8x1xf32>
    %cst_26 = arith.constant 6.400000e+01 : f32
    %59 = vector.broadcast %cst_26 : f32 to vector<1x8x1xf32>
    %60 = arith.divf %58, %59 : vector<1x8x1xf32>
    %61 = vector.extract_strided_slice %1 {offsets = [0, 2], sizes = [8, 1], strides = [1, 1]} : vector<8x6xf32> to vector<8x1xf32>
    %62 = vector.extract_strided_slice %1 {offsets = [0, 3], sizes = [8, 1], strides = [1, 1]} : vector<8x6xf32> to vector<8x1xf32>
    %cst_27 = arith.constant 9.99999974E-6 : f32
    %63 = vector.broadcast %cst_27 : f32 to vector<1x8x1xf32>
    %64 = arith.addf %60, %63 : vector<1x8x1xf32>
    %65 = math.rsqrt %64 : vector<1x8x1xf32>
    %66 = vector.shape_cast %61 : vector<8x1xf32> to vector<1x8x1xf32>
    %67 = arith.mulf %65, %66 : vector<1x8x1xf32>
    %68 = arith.mulf %51, %67 : vector<1x8x1xf32>
    %69 = vector.shape_cast %62 : vector<8x1xf32> to vector<1x8x1xf32>
    %70 = arith.subf %69, %68 : vector<1x8x1xf32>
    %71 = vector.broadcast %67 : vector<1x8x1xf32> to vector<4x8x16xf32>
    %72 = arith.mulf %45, %71 : vector<4x8x16xf32>
    %73 = vector.broadcast %70 : vector<1x8x1xf32> to vector<4x8x16xf32>
    %74 = arith.addf %72, %73 : vector<4x8x16xf32>
    %75 = vector.shape_cast %74 : vector<4x8x16xf32> to vector<32x16xf32>
    %c0_28 = arith.constant 0 : index
    %c0_29 = arith.constant 0 : index
    %76 = vector.load %arg6[%c0_28, %c0_29] : memref<16x4xf32, #tpu.memory_space<vmem>>, vector<16x4xf32>
    %cst_30 = arith.constant dense<0.000000e+00> : vector<32x4xf32>
    %77 = tpu.matmul %75, %76, %cst_30 {dimension_numbers = #tpu.dot_dimension_numbers<[1], [0], [0], [1], [0, 0, 1, 1], [], []>} : vector<32x16xf32>, vector<16x4xf32>, vector<32x4xf32> -> vector<32x4xf32>
    %c0_31 = arith.constant 0 : index
    %c0_32 = arith.constant 0 : index
    %78 = vector.load %arg7[%c0_31, %c0_32] : memref<1x4xf32, #tpu.memory_space<vmem>>, vector<1x4xf32>
    %79 = vector.broadcast %78 : vector<1x4xf32> to vector<32x4xf32>
    %80 = arith.addf %77, %79 : vector<32x4xf32>
    %81 = vector.shape_cast %80 : vector<32x4xf32> to vector<4x8x4xf32>
    %cst_33 = arith.constant dense<0.000000e+00> : vector<4x8xf32>
    %82 = vector.multi_reduction <add>, %81, %cst_33 [2] : vector<4x8x4xf32> to vector<4x8xf32>
    %83 = vector.shape_cast %82 : vector<4x8xf32> to vector<4x8x1xf32>
    %cst_34 = arith.constant dense<0.000000e+00> : vector<8x1xf32>
    %84 = vector.multi_reduction <add>, %83, %cst_34 [0] : vector<4x8x1xf32> to vector<8x1xf32>
    %85 = vector.shape_cast %84 : vector<8x1xf32> to vector<1x8x1xf32>
    %cst_35 = arith.constant 1.600000e+01 : f32
    %86 = vector.broadcast %cst_35 : f32 to vector<1x8x1xf32>
    %87 = arith.divf %85, %86 : vector<1x8x1xf32>
    %88 = vector.broadcast %87 : vector<1x8x1xf32> to vector<4x8x4xf32>
    %89 = arith.subf %81, %88 : vector<4x8x4xf32>
    %90 = arith.mulf %89, %89 : vector<4x8x4xf32>
    %cst_36 = arith.constant dense<0.000000e+00> : vector<4x8xf32>
    %91 = vector.multi_reduction <add>, %90, %cst_36 [2] : vector<4x8x4xf32> to vector<4x8xf32>
    %92 = vector.shape_cast %91 : vector<4x8xf32> to vector<4x8x1xf32>
    %cst_37 = arith.constant dense<0.000000e+00> : vector<8x1xf32>
    %93 = vector.multi_reduction <add>, %92, %cst_37 [0] : vector<4x8x1xf32> to vector<8x1xf32>
    %94 = vector.shape_cast %93 : vector<8x1xf32> to vector<1x8x1xf32>
    %cst_38 = arith.constant 1.600000e+01 : f32
    %95 = vector.broadcast %cst_38 : f32 to vector<1x8x1xf32>
    %96 = arith.divf %94, %95 : vector<1x8x1xf32>
    %97 = vector.extract_strided_slice %1 {offsets = [0, 4], sizes = [8, 1], strides = [1, 1]} : vector<8x6xf32> to vector<8x1xf32>
    %98 = vector.extract_strided_slice %1 {offsets = [0, 5], sizes = [8, 1], strides = [1, 1]} : vector<8x6xf32> to vector<8x1xf32>
    %cst_39 = arith.constant 9.99999974E-6 : f32
    %99 = vector.broadcast %cst_39 : f32 to vector<1x8x1xf32>
    %100 = arith.addf %96, %99 : vector<1x8x1xf32>
    %101 = math.rsqrt %100 : vector<1x8x1xf32>
    %102 = vector.shape_cast %97 : vector<8x1xf32> to vector<1x8x1xf32>
    %103 = arith.mulf %101, %102 : vector<1x8x1xf32>
    %104 = arith.mulf %87, %103 : vector<1x8x1xf32>
    %105 = vector.shape_cast %98 : vector<8x1xf32> to vector<1x8x1xf32>
    %106 = arith.subf %105, %104 : vector<1x8x1xf32>
    %107 = vector.broadcast %103 : vector<1x8x1xf32> to vector<4x8x4xf32>
    %108 = arith.mulf %81, %107 : vector<4x8x4xf32>
    %109 = vector.broadcast %106 : vector<1x8x1xf32> to vector<4x8x4xf32>
    %110 = arith.addf %108, %109 : vector<4x8x4xf32>
    %c0_40 = arith.constant 0 : index
    %c0_41 = arith.constant 0 : index
    %111 = vector.load %arg8[%c0_40, %c0_41] : memref<1x4xf32, #tpu.memory_space<vmem>>, vector<1x4xf32>
    %112 = vector.shape_cast %111 : vector<1x4xf32> to vector<1x1x4xf32>
    %113 = vector.broadcast %112 : vector<1x1x4xf32> to vector<4x8x4xf32>
    %114 = arith.mulf %110, %113 : vector<4x8x4xf32>
    %cst_42 = arith.constant dense<0.000000e+00> : vector<4x8xf32>
    %115 = vector.multi_reduction <add>, %114, %cst_42 [2] : vector<4x8x4xf32> to vector<4x8xf32>
    %c0_43 = arith.constant 0 : index
    %c0_44 = arith.constant 0 : index
    %116 = vector.load %arg9[%c0_43, %c0_44] : memref<1x1xf32, #tpu.memory_space<vmem>>, vector<1x1xf32>
    %117 = vector.broadcast %116 : vector<1x1xf32> to vector<4x8xf32>
    %118 = arith.addf %115, %117 : vector<4x8xf32>
    %c0_45 = arith.constant 0 : index
    %c0_46 = arith.constant 0 : index
    %c0_47 = arith.constant 0 : index
    %119 = vector.load %arg11[%c0_45, %c0_46, %c0_47] : memref<1x4x8xf32, #tpu.memory_space<vmem>>, vector<1x4x8xf32>
    %120 = vector.shape_cast %119 : vector<1x4x8xf32> to vector<4x8xf32>
    %121 = vector.shape_cast %118 : vector<4x8xf32> to vector<1x4x8xf32>
    tpu.vector_store %arg11[%c0_45, %c0_46, %c0_47], %121 {strides = array<i32>} : memref<1x4x8xf32, #tpu.memory_space<vmem>>, vector<1x4x8xf32>,
    return
  }
  func.func @transform_0(%arg0: i32) -> (i32, i32, i32) {
    %c0_i32 = arith.constant 0 : i32
    %c0_i32_0 = arith.constant 0 : i32
    %c0_i32_1 = arith.constant 0 : i32
    return %c0_i32, %arg0, %c0_i32_0 : i32, i32, i32
  }
  func.func @transform_1(%arg0: i32) -> (i32, i32) {
    %c0_i32 = arith.constant 0 : i32
    %c0_i32_0 = arith.constant 0 : i32
    %c0_i32_1 = arith.constant 0 : i32
    return %c0_i32, %c0_i32_0 : i32, i32
  }
  func.func @transform_2(%arg0: i32) -> (i32, i32) {
    %c0_i32 = arith.constant 0 : i32
    %c0_i32_0 = arith.constant 0 : i32
    %c0_i32_1 = arith.constant 0 : i32
    return %c0_i32, %c0_i32_0 : i32, i32
  }
  func.func @transform_3(%arg0: i32) -> (i32, i32) {
    %c0_i32 = arith.constant 0 : i32
    %c0_i32_0 = arith.constant 0 : i32
    %c0_i32_1 = arith.constant 0 : i32
    return %c0_i32, %c0_i32_0 : i32, i32
  }
  func.func @transform_4(%arg0: i32) -> (i32, i32) {
    %c0_i32 = arith.constant 0 : i32
    %c0_i32_0 = arith.constant 0 : i32
    %c0_i32_1 = arith.constant 0 : i32
    return %c0_i32, %c0_i32_0 : i32, i32
  }
  func.func @transform_5(%arg0: i32) -> (i32, i32) {
    %c0_i32 = arith.constant 0 : i32
    %c0_i32_0 = arith.constant 0 : i32
    %c0_i32_1 = arith.constant 0 : i32
    return %c0_i32, %c0_i32_0 : i32, i32
  }
  func.func @transform_6(%arg0: i32) -> (i32, i32) {
    %c0_i32 = arith.constant 0 : i32
    %c0_i32_0 = arith.constant 0 : i32
    %c0_i32_1 = arith.constant 0 : i32
    return %c0_i32, %c0_i32_0 : i32, i32
  }
  func.func @transform_7(%arg0: i32) -> (i32, i32) {
    %c0_i32 = arith.constant 0 : i32
    %c0_i32_0 = arith.constant 0 : i32
    %c0_i32_1 = arith.constant 0 : i32
    return %c0_i32, %c0_i32_0 : i32, i32
  }
  func.func @transform_8(%arg0: i32) -> (i32, i32) {
    %c0_i32 = arith.constant 0 : i32
    %c0_i32_0 = arith.constant 0 : i32
    %c0_i32_1 = arith.constant 0 : i32
    return %c0_i32, %c0_i32_0 : i32, i32
  }
  func.func @transform_9(%arg0: i32) -> (i32, i32, i32) {
    %c0_i32 = arith.constant 0 : i32
    %c0_i32_0 = arith.constant 0 : i32
    %c0_i32_1 = arith.constant 0 : i32
    return %arg0, %c0_i32, %c0_i32_0 : i32, i32, i32
  }
  func.func @transform_10(%arg0: i32) -> (i32, i32, i32) {
    %c0_i32 = arith.constant 0 : i32
    %c0_i32_0 = arith.constant 0 : i32
    %c0_i32_1 = arith.constant 0 : i32
    return %arg0, %c0_i32, %c0_i32_0 : i32, i32, i32
  }
}

</mosaic_0001>

<bundles_post_ra>
// kernel: tpu_custom_call.1
= control target key start
LH: loop header
LB: loop body
LE: loop exit
PB: predicated region body
PF: predicated region fallthrough
CT: control target
= control target key end

     0   :  { %s2416_s0 = inlined_call_operand.vmem [shape: f32[4,32,576], index: 0, kind: input, shape index: {}]   ;;  %s2417_s1 = inlined_call_operand.vmem [shape: f32[576,64], index: 1, kind: input, shape index: {}]   ;;  %s2418_s2 = inlined_call_operand.vmem [shape: f32[1,64], index: 2, kind: input, shape index: {}]   ;;  %s2419_s3 = inlined_call_operand.vmem [shape: f32[64,16], index: 3, kind: input, shape index: {}]   ;;  %s2420_s4 = inlined_call_operand.vmem [shape: f32[1,16], index: 4, kind: input, shape index: {}]   ;;  %s2421_s5 = inlined_call_operand.vmem [shape: f32[16,4], index: 5, kind: input, shape index: {}]   ;;  %s2422_s6 = inlined_call_operand.vmem [shape: f32[1,4], index: 6, kind: input, shape index: {}]   ;;  %s2423_s7 = inlined_call_operand.vmem [shape: f32[1,4], index: 7, kind: input, shape index: {}]   ;;  %s2424_s8 = inlined_call_operand.<no memory space> [shape: f32[1,1], index: 8, kind: input, shape index: {}]   ;;  %s2425_s9 = inlined_call_operand.vmem [shape: f32[4,8,6], index: 9, kind: input, shape index: {}]   ;;  %s2426_s10 = inlined_call_operand.hbm [shape: f32[4,4,8], index: 10, kind: output, shape index: {}]  }
   0x1   :  { %v15_v0 = vstv %s2424_s8 }
   0x2   :  { %16 = vst [vmem:[#allocation2] sm:$0x1] %v15_v0 }
   0x3   :  { %17 = vsyncpa [#allocation5], 0 }
   0x4   :  { %19 = vsyncpa [#allocation5 + $0x1], 0  ;;  %s1881_s15 = smov 0   ;;  %s1883_s16 = smov 0  }
   0x5   :  { %s1885_s17 = smov 0   ;;  %s1887_s18 = smov 0  }
   0x6 LB: > { %s1902_s8 = sadd.s32 4294967295, %s1813_s18   ;;  %s1386_s19 = sadd.s32 4294967294, %s1813_s18   ;;  %s1813_s18 = sphi %s1887_s18, %s2432_s18   ;;  %s1809_s17 = sphi %s1885_s17, %s2431_s17   ;;  %s1805_s16 = sphi %s1883_s16, %s2430_s16   ;;  %s1801_s15 = sphi %s1881_s15, %s2429_s15  }
   0x7   : > { %s1906_s20 = sadd.s32 1, %s1813_s18   ;;  %s32_s21 = sadd.s32 1, %s1809_s17 }
   0x8   : > { %s29_s22 = ssub.s32 %s1813_s18, %s1906_s20  ;;  %p39_p0 = scmp.ne.s32.totalorder %s1809_s17, %s1805_s16 }
   0x9   : > { %p30_p1 = scmp.eq.s32.totalorder %s29_s22, 0  ;;  %p40_p2 = scmp.eq.s32.totalorder %s1813_s18, 0 }
   0xa   : > { %p263_p3 = scmp.eq.s32.totalorder %s1902_s8, 3  ;;  %p268_p4 = scmp.ne.s32.totalorder %s1805_s16, %s1801_s15 }
   0xb   : > { %s1918_s23 = scalar_select %p30_p1, %s1809_s17, %s32_s21  }
   0xc   : > { %p41_p5 = por %p40_p2, %p39_p0  ;;  %p1920_p6 = por %p263_p3, %p39_p0 }
   0xd   : > { %p269_p7 = scmp.eq.s32.totalorder %s1386_s19, 3  ;;  %p1388_p9 = scmp.ge.s32.totalorder %s1813_s18, 4 }
   0xf   : > { %p1924_p8 = por %p269_p7, %p268_p4  ;;  %309 = sbr.rel (%p1388_p9) target bundleno = 37 (0x25), region = 48 }
  0x16   : > { %312 = sbr.rel (!%p41_p5) target bundleno = 37 (0x25), region = 52  ;;  %s314_s26 = sand.u32 (%p41_p5), 1, %s1809_s17  }
  0x17   : > { %s1689_s27 = smul.u32 (%p41_p5), 40, %s1813_s18 }
  0x18   : > { %s1688_s28 = smul.u32 (%p41_p5), 160, %s314_s26 }
  0x19   : > { %s1934_s11 = scalar_lea.vmem (%p41_p5), %s2416_s0, %s1689_s27 }
  0x1a   : > { %v332_v1 = vld [vmem:[%s1934_s11] sm:$0xff] (%p41_p5)  ;;  %v334_v2 = vld [vmem:[%s1934_s11 + $0x8] sm:$0xff] (%p41_p5)  ;;  %v336_v3 = vld [vmem:[%s1934_s11 + $0x10] sm:$0xff] (%p41_p5)  ;;  %s1939_s12 = scalar_lea.vmem (%p41_p5), [#allocation3], %s1688_s28 }
  0x1b   : > { %333 = vst [vmem:[%s1939_s12] sm:$0xff] (%p41_p5), %v332_v1  ;;  %335 = vst [vmem:[%s1939_s12 + $0x8] sm:$0xff] (%p41_p5), %v334_v2  ;;  %v338_v4 = vld [vmem:[%s1934_s11 + $0x18] sm:$0xff] (%p41_p5)  ;;  %v340_v5 = vld [vmem:[%s1934_s11 + $0x20] sm:$0xff] (%p41_p5) }
  0x1c   : > { %337 = vst [vmem:[%s1939_s12 + $0x10] sm:$0xff] (%p41_p5), %v336_v3  ;;  %v342_v6 = vld [vmem:[%s1934_s11 + $0xa0] sm:$0xff] (%p41_p5)  ;;  %339 = vst [vmem:[%s1939_s12 + $0x18] sm:$0xff] (%p41_p5), %v338_v4  ;;  %v344_v7 = vld [vmem:[%s1934_s11 + $0xa8] sm:$0xff] (%p41_p5) }
  0x1d   : > { %341 = vst [vmem:[%s1939_s12 + $0x20] sm:$0xff] %v340_v5  ;;  %343 = vst [vmem:[%s1939_s12 + $0x28] sm:$0xff] %v342_v6  ;;  %v346_v8 = vld [vmem:[%s1934_s11 + $0xb0] sm:$0xff]  ;;  %v348_v9 = vld [vmem:[%s1934_s11 + $0xb8] sm:$0xff] }
  0x1e   : > { %345 = vst [vmem:[%s1939_s12 + $0x30] sm:$0xff] %v344_v7  ;;  %347 = vst [vmem:[%s1939_s12 + $0x38] sm:$0xff] %v346_v8  ;;  %v350_v10 = vld [vmem:[%s1934_s11 + $0xc0] sm:$0xff]  ;;  %v354_v12 = vld [vmem:[%s1934_s11 + $0x148] sm:$0xff] }
  0x1f   : > { %349 = vst [vmem:[%s1939_s12 + $0x40] sm:$0xff] %v348_v9  ;;  %v352_v11 = vld [vmem:[%s1934_s11 + $0x140] sm:$0xff]  ;;  %351 = vst [vmem:[%s1939_s12 + $0x48] sm:$0xff] %v350_v10  ;;  %v356_v13 = vld [vmem:[%s1934_s11 + $0x150] sm:$0xff] }
  0x20   : > { %353 = vst [vmem:[%s1939_s12 + $0x50] sm:$0xff] %v352_v11  ;;  %355 = vst [vmem:[%s1939_s12 + $0x58] sm:$0xff] %v354_v12  ;;  %v358_v14 = vld [vmem:[%s1934_s11 + $0x158] sm:$0xff]  ;;  %v360_v15 = vld [vmem:[%s1934_s11 + $0x160] sm:$0xff] }
  0x21   : > { %357 = vst [vmem:[%s1939_s12 + $0x60] sm:$0xff] %v356_v13  ;;  %359 = vst [vmem:[%s1939_s12 + $0x68] sm:$0xff] %v358_v14  ;;  %v362_v16 = vld [vmem:[%s1934_s11 + $0x1e0] sm:$0xff]  ;;  %v364_v17 = vld [vmem:[%s1934_s11 + $0x1e8] sm:$0xff] }
  0x22   : > { %361 = vst [vmem:[%s1939_s12 + $0x70] sm:$0xff] %v360_v15  ;;  %v366_v18 = vld [vmem:[%s1934_s11 + $0x1f0] sm:$0xff]  ;;  %363 = vst [vmem:[%s1939_s12 + $0x78] sm:$0xff] %v362_v16  ;;  %v368_v19 = vld [vmem:[%s1934_s11 + $0x1f8] sm:$0xff] }
  0x23   : > { %365 = vst [vmem:[%s1939_s12 + $0x80] sm:$0xff] %v364_v17  ;;  %367 = vst [vmem:[%s1939_s12 + $0x88] sm:$0xff] %v366_v18  ;;  %v370_v20 = vld [vmem:[%s1934_s11 + $0x200] sm:$0xff] }
  0x24   : > { %369 = vst [vmem:[%s1939_s12 + $0x90] sm:$0xff] %v368_v19  ;;  %371 = vst [vmem:[%s1939_s12 + $0x98] sm:$0xff] %v370_v20 }
  0x25 PF: > { %p1390_p10 = scmp.ge.s32.totalorder %s1813_s18, 1  ;;  %p383_p11 = scmp.lt.s32.totalorder %s1813_s18, 5 }
  0x27   : > { %p384_p12 = pnand %p1390_p10, %p383_p11 }
  0x28   : > { %v472_v21 = vld [vmem:[%s2417_s1 + $0x80] sm:$0xff] (!%p384_p12)  ;;  %v473_v22 = vld [vmem:[%s2417_s1 + $0x88] sm:$0xff] (!%p384_p12)  ;;  %v474_v32 = vld [vmem:[%s2417_s1 + $0x90] sm:$0xff] (!%p384_p12)  ;;  %s2080_s27 = sand.u32 (!%p384_p12), 1, %s1805_s16   ;;  %vm535_vm0 = vcmask (!%p384_p12), 523264   ;;  %p431_p13 = scmp.lt.s32.totalorder (!%p384_p12), %s1902_s8, 3 }
  0x29   : > { %387 = sbr.rel (%p384_p12) target bundleno = 2644 (0xa54), region = 79  ;;  %v456_v23 = vld [vmem:[%s2417_s1] sm:$0xff] (!%p384_p12)  ;;  %v1586_v24 = vpack.c.bf16 (!%p384_p12), %v473_v22, %v472_v21  ;;  %v457_v25 = vld [vmem:[%s2417_s1 + $0x8] sm:$0xff] (!%p384_p12)  ;;  %v475_v34 = vld [vmem:[%s2417_s1 + $0x98] sm:$0xff] (!%p384_p12)  ;;  %s1816_s30 = smov (!%p384_p12), 1   ;;  %vm983_vm1 = vcmask (!%p384_p12), 130048  }
  0x2a   : > { %v504_v26 = vld [vmem:[%s2417_s1 + $0x180] sm:$0xff] (!%p384_p12)  ;;  %v505_v27 = vld [vmem:[%s2417_s1 + $0x188] sm:$0xff] (!%p384_p12)  ;;  %v1588_v28 = vpack.c.bf16 (!%p384_p12), %v457_v25, %v456_v23  ;;  %v458_v35 = vld [vmem:[%s2417_s1 + $0x10] sm:$0xff] (!%p384_p12)  ;;  %v1590_v37 = vpack.c.bf16 (!%p384_p12), %v475_v34, %v474_v32  ;;  %s1690_s29 = smul.u32 (!%p384_p12), 160, %s2080_s27  ;;  %vm1158_vm2 = vcmask (!%p384_p12), 31744   ;;  %vm1286_vm3 = vcmask (!%p384_p12), 1041409  }
  0x2b   : > { %v1618_v29 = vpack.c.bf16 (!%p384_p12), %v505_v27, %v504_v26  ;;  %v488_v30 = vld [vmem:[%s2417_s1 + $0x100] sm:$0xff] (!%p384_p12)  ;;  %v489_v31 = vld [vmem:[%s2417_s1 + $0x108] sm:$0xff] (!%p384_p12)  ;;  %1587 = vmatprep.subr.bf16.mxu0 (!%p384_p12), %v1586_v24  ;;  %v459_v36 = vld [vmem:[%s2417_s1 + $0x18] sm:$0xff] (!%p384_p12)  ;;  %vm1288_vm4 = vcmask (!%p384_p12), 1042434   ;;  %vm1290_vm5 = vcmask (!%p384_p12), 1043459   ;;  %vm1293_vm6 = vcmask (!%p384_p12), 60416  }
  0x2c   : > { %v1620_v33 = vpack.c.bf16 (!%p384_p12), %v489_v31, %v488_v30  ;;  %1589 = vmatpush3.bf16.msra.mxu0 (!%p384_p12), %v1588_v28  ;;  %v1592_v38 = vpack.c.bf16 (!%p384_p12), %v459_v36, %v458_v35  ;;  %v506_v39 = vld [vmem:[%s2417_s1 + $0x190] sm:$0xff] (!%p384_p12)  ;;  %v507_v40 = vld [vmem:[%s2417_s1 + $0x198] sm:$0xff] (!%p384_p12)  ;;  %v476_v44 = vld [vmem:[%s2417_s1 + $0xa0] sm:$0xff] (!%p384_p12)  ;;  %s2143_s26 = scalar_lea.vmem (!%p384_p12), [#allocation3], %s1690_s29  ;;  %s1296_s29 = scalar_lea.sflag (!%p384_p12), [#allocation5], %s2080_s27 }
  0x2d   : > { %1619 = vmatprep.subr.bf16.mxu1 (!%p384_p12), %v1618_v29  ;;  %v490_v41 = vld [vmem:[%s2417_s1 + $0x110] sm:$0xff] (!%p384_p12)  ;;  %v1622_v42 = vpack.c.bf16 (!%p384_p12), %v507_v40, %v506_v39  ;;  %v491_v43 = vld [vmem:[%s2417_s1 + $0x118] sm:$0xff] (!%p384_p12)  ;;  %v477_v45 = vld [vmem:[%s2417_s1 + $0xa8] sm:$0xff] (!%p384_p12)  ;;  %1591 = vmatprep.subr.bf16.mxu0 (!%p384_p12), %v1590_v37  ;;  %s1822_s19 = smov (!%p384_p12), [#allocation4]  }
  0x2e   : > { %1621 = vmatpush3.bf16.msra.mxu1 (!%p384_p12), %v1620_v33  ;;  %v1624_v46 = vpack.c.bf16 (!%p384_p12), %v491_v43, %v490_v41  ;;  %v1594_v47 = vpack.c.bf16 (!%p384_p12), %v477_v45, %v476_v44  ;;  %v460_v48 = vld [vmem:[%s2417_s1 + $0x20] sm:$0xff] (!%p384_p12)  ;;  %v461_v49 = vld [vmem:[%s2417_s1 + $0x28] sm:$0xff] (!%p384_p12)  ;;  %v478_v56 = vld [vmem:[%s2417_s1 + $0xb0] sm:$0xff] (!%p384_p12)  ;;  %s1755_s21 = sshll.u32 (!%p384_p12), %s1822_s19, 4  ;;  %s1756_s21 = int_to_ptr.vmem [resolvable:$false] %s1755_s21 }
  0x2f   : > { %v508_v50 = vld [vmem:[%s2417_s1 + $0x1a0] sm:$0xff] (!%p384_p12)  ;;  %1623 = vmatprep.subr.bf16.mxu1 (!%p384_p12), %v1622_v42  ;;  %v509_v51 = vld [vmem:[%s2417_s1 + $0x1a8] sm:$0xff] (!%p384_p12)  ;;  %v1596_v54 = vpack.c.bf16 (!%p384_p12), %v461_v49, %v460_v48  ;;  %v479_v57 = vld [vmem:[%s2417_s1 + $0xb8] sm:$0xff] (!%p384_p12)  ;;  %s1757_s22 = scalar_lea.vmem (!%p384_p12), %s1756_s21, 128 }
  0x30   : > { %v492_v52 = vld [vmem:[%s2417_s1 + $0x120] sm:$0xff]  ;;  %v493_v53 = vld [vmem:[%s2417_s1 + $0x128] sm:$0xff]  ;;  %1593 = vmatpush3.bf16.msra.mxu0 %v1592_v38  ;;  %v1626_v55 = vpack.c.bf16 %v509_v51, %v508_v50  ;;  %v462_v58 = vld [vmem:[%s2417_s1 + $0x30] sm:$0xff]  ;;  %v1598_v60 = vpack.c.bf16 %v479_v57, %v478_v56 }
  0x31   : > { %1595 = vmatprep.subr.bf16.mxu0 %v1594_v47  ;;  %v1628_v59 = vpack.c.bf16 %v493_v53, %v492_v52  ;;  %v463_v61 = vld [vmem:[%s2417_s1 + $0x38] sm:$0xff]  ;;  %v510_v62 = vld [vmem:[%s2417_s1 + $0x1b0] sm:$0xff]  ;;  %v480_v3 = vld [vmem:[%s2417_s1 + $0xc0] sm:$0xff] }
  0x32   : > { %1625 = vmatpush3.bf16.msra.mxu1 %v1624_v46  ;;  %v511_v63 = vld [vmem:[%s2417_s1 + $0x1b8] sm:$0xff]  ;;  %v494_v1 = vld [vmem:[%s2417_s1 + $0x130] sm:$0xff]  ;;  %v481_v4 = vld [vmem:[%s2417_s1 + $0xc8] sm:$0xff]  ;;  %v1600_v5 = vpack.c.bf16 %v463_v61, %v462_v58 }
  0x33   : > { %1627 = vmatprep.subr.bf16.mxu1 %v1626_v55  ;;  %v1630_v0 = vpack.c.bf16 %v511_v63, %v510_v62  ;;  %v495_v2 = vld [vmem:[%s2417_s1 + $0x138] sm:$0xff]  ;;  %v512_v6 = vld [vmem:[%s2417_s1 + $0x1c0] sm:$0xff]  ;;  %v513_v7 = vld [vmem:[%s2417_s1 + $0x1c8] sm:$0xff]  ;;  %v1602_v9 = vpack.c.bf16 %v481_v4, %v480_v3 }
  0x34   : > { %1597 = vmatpush3.bf16.msra.mxu0 %v1596_v54  ;;  %v1632_v8 = vpack.c.bf16 %v495_v2, %v494_v1  ;;  %v464_v10 = vld [vmem:[%s2417_s1 + $0x40] sm:$0xff]  ;;  %v465_v11 = vld [vmem:[%s2417_s1 + $0x48] sm:$0xff]  ;;  %v1634_v13 = vpack.c.bf16 %v513_v7, %v512_v6  ;;  %v482_v15 = vld [vmem:[%s2417_s1 + $0xd0] sm:$0xff] }
  0x35   : > { %1599 = vmatprep.subr.bf16.mxu0 %v1598_v60  ;;  %v496_v12 = vld [vmem:[%s2417_s1 + $0x140] sm:$0xff]  ;;  %v497_v14 = vld [vmem:[%s2417_s1 + $0x148] sm:$0xff]  ;;  %v483_v16 = vld [vmem:[%s2417_s1 + $0xd8] sm:$0xff]  ;;  %v1604_v19 = vpack.c.bf16 %v465_v11, %v464_v10 }
  0x36   : > { %1629 = vmatpush3.bf16.msra.mxu1 %v1628_v59  ;;  %v514_v17 = vld [vmem:[%s2417_s1 + $0x1d0] sm:$0xff]  ;;  %v515_v18 = vld [vmem:[%s2417_s1 + $0x1d8] sm:$0xff]  ;;  %v1636_v20 = vpack.c.bf16 %v497_v14, %v496_v12  ;;  %v1606_v21 = vpack.c.bf16 %v483_v16, %v482_v15  ;;  %v484_v27 = vld [vmem:[%s2417_s1 + $0xe0] sm:$0xff] }
  0x37   : > { %1631 = vmatprep.subr.bf16.mxu1 %v1630_v0  ;;  %v466_v22 = vld [vmem:[%s2417_s1 + $0x50] sm:$0xff]  ;;  %v467_v23 = vld [vmem:[%s2417_s1 + $0x58] sm:$0xff]  ;;  %v1638_v25 = vpack.c.bf16 %v515_v18, %v514_v17  ;;  %v485_v28 = vld [vmem:[%s2417_s1 + $0xe8] sm:$0xff] }
  0x38   : > { %1601 = vmatpush3.bf16.msra.mxu0 %v1600_v5  ;;  %v498_v24 = vld [vmem:[%s2417_s1 + $0x150] sm:$0xff]  ;;  %v499_v26 = vld [vmem:[%s2417_s1 + $0x158] sm:$0xff]  ;;  %v516_v29 = vld [vmem:[%s2417_s1 + $0x1e0] sm:$0xff]  ;;  %v1608_v31 = vpack.c.bf16 %v467_v23, %v466_v22  ;;  %v1610_v35 = vpack.c.bf16 %v485_v28, %v484_v27 }
  0x39   : > { %1603 = vmatprep.subr.bf16.mxu0 %v1602_v9  ;;  %v517_v30 = vld [vmem:[%s2417_s1 + $0x1e8] sm:$0xff]  ;;  %v468_v32 = vld [vmem:[%s2417_s1 + $0x60] sm:$0xff]  ;;  %v1640_v34 = vpack.c.bf16 %v499_v26, %v498_v24  ;;  %v486_v40 = vld [vmem:[%s2417_s1 + $0xf0] sm:$0xff] }
  0x3a   : > { %1633 = vmatpush3.bf16.msra.mxu1 %v1632_v8  ;;  %v437_v33 = vld [vmem:[%s2143_s26 + $0x8] sm:$0xff]  ;;  %v500_v37 = vld [vmem:[%s2417_s1 + $0x160] sm:$0xff]  ;;  %v1642_v39 = vpack.c.bf16 %v517_v30, %v516_v29  ;;  %v487_v41 = vld [vmem:[%s2417_s1 + $0xf8] sm:$0xff] }
  0x3b   : > { %1635 = vmatprep.subr.bf16.mxu1 %v1634_v13  ;;  %v469_v36 = vld [vmem:[%s2417_s1 + $0x68] sm:$0xff]  ;;  %612 = vmatprep.mubr.f32.mxu0 %v437_v33  ;;  %v439_v42 = vld [vmem:[%s2143_s26 + $0x18] sm:$0xff]  ;;  %v518_v43 = vld [vmem:[%s2417_s1 + $0x1f0] sm:$0xff]  ;;  %v1614_v47 = vpack.c.bf16 %v487_v41, %v486_v40 }
  0x3c   : > { %1605 = vmatpush3.bf16.msra.mxu0 %v1604_v19  ;;  %v501_v38 = vld [vmem:[%s2417_s1 + $0x168] sm:$0xff]  ;;  %v519_v44 = vld [vmem:[%s2417_s1 + $0x1f8] sm:$0xff]  ;;  %697 = vmatprep.mubr.f32.mxu1 %v439_v42  ;;  %v1612_v45 = vpack.c.bf16 %v469_v36, %v468_v32  ;;  %v470_v48 = vld [vmem:[%s2417_s1 + $0x70] sm:$0xff] }
  0x3d   : > { %1607 = vmatprep.subr.bf16.mxu0 %v1606_v21  ;;  %v1644_v46 = vpack.c.bf16 %v501_v38, %v500_v37  ;;  %v471_v49 = vld [vmem:[%s2417_s1 + $0x78] sm:$0xff]  ;;  %v502_v50 = vld [vmem:[%s2417_s1 + $0x170] sm:$0xff]  ;;  %v1646_v51 = vpack.c.bf16 %v519_v44, %v518_v43  ;;  %v520_v53 = vld [vmem:[%s2417_s1 + $0x200] sm:$0xff] }
  0x3e   : > { %1637 = vmatpush3.bf16.msra.mxu1 %v1636_v20  ;;  %v503_v52 = vld [vmem:[%s2417_s1 + $0x178] sm:$0xff]  ;;  %v521_v54 = vld [vmem:[%s2417_s1 + $0x208] sm:$0xff]  ;;  %v1616_v55 = vpack.c.bf16 %v471_v49, %v470_v48  ;;  %v522_v58 = vld [vmem:[%s2417_s1 + $0x210] sm:$0xff] }
  0x3f   : > { %1639 = vmatprep.subr.bf16.mxu1 %v1638_v25  ;;  %v1648_v56 = vpack.c.bf16 %v503_v52, %v502_v50  ;;  %v1650_v57 = vpack.c.bf16 %v521_v54, %v520_v53  ;;  %v523_v59 = vld [vmem:[%s2417_s1 + $0x218] sm:$0xff]  ;;  %v436_v60 = vld [vmem:[%s2143_s26] sm:$0xff]  ;;  %v441_v3 = vld [vmem:[%s2143_s26 + $0x28] sm:$0xff] }
  0x40   : > { %1609 = vmatpush3.bf16.msra.mxu0 %v1608_v31  ;;  %v438_v61 = vld [vmem:[%s2143_s26 + $0x10] sm:$0xff]  ;;  %v1654_v62 = vpack.c.bf16 %v523_v59, %v522_v58  ;;  %v524_v0 = vld [vmem:[%s2417_s1 + $0x220] sm:$0xff]  ;;  %v525_v1 = vld [vmem:[%s2417_s1 + $0x228] sm:$0xff] }
  0x41   : > { %1611 = vmatprep.subr.bf16.mxu0 %v1610_v35  ;;  %v442_v63 = vld [vmem:[%s2143_s26 + $0x30] sm:$0xff]  ;;  %v444_v2 = vld [vmem:[%s2143_s26 + $0x40] sm:$0xff]  ;;  %v443_v4 = vld [vmem:[%s2143_s26 + $0x38] sm:$0xff]  ;;  %v1658_v5 = vpack.c.bf16 %v525_v1, %v524_v0 }
  0x42   : > { %1641 = vmatpush3.bf16.msra.mxu1 %v1640_v34  ;;  %v447_v6 = vld [vmem:[%s2143_s26 + $0x58] sm:$0xff]  ;;  %v526_v7 = vld [vmem:[%s2417_s1 + $0x230] sm:$0xff]  ;;  %v448_v11 = vld [vmem:[%s2143_s26 + $0x60] sm:$0xff] }
  0x43   : > { %1643 = vmatprep.subr.bf16.mxu1 %v1642_v39  ;;  %v527_v8 = vld [vmem:[%s2417_s1 + $0x238] sm:$0xff]  ;;  %v449_v9 = vld [vmem:[%s2143_s26 + $0x68] sm:$0xff]  ;;  %v452_v13 = vld [vmem:[%s2143_s26 + $0x80] sm:$0xff] }
  0x44   : > { %1613 = vmatpush3.bf16.msra.mxu0 %v1612_v45  ;;  %v446_v10 = vld [vmem:[%s2143_s26 + $0x50] sm:$0xff]  ;;  %v1662_v12 = vpack.c.bf16 %v527_v8, %v526_v7  ;;  %v451_v15 = vld [vmem:[%s2143_s26 + $0x78] sm:$0xff]  ;;  %v453_v16 = vld [vmem:[%s2143_s26 + $0x88] sm:$0xff] }
  0x45   : > { %1615 = vmatprep.subr.bf16.mxu0 %v1614_v47  ;;  %v454_v14 = vld [vmem:[%s2143_s26 + $0x90] sm:$0xff]  ;;  %v440_v17 = vld [vmem:[%s2143_s26 + $0x20] sm:$0xff]  ;;  %v445_v18 = vld [vmem:[%s2143_s26 + $0x48] sm:$0xff] }
  0x46   : > { %1645 = vmatpush3.bf16.msra.mxu1 %v1644_v46  ;;  %v450_v19 = vld [vmem:[%s2143_s26 + $0x70] sm:$0xff]  ;;  %v455_v20 = vld [vmem:[%s2143_s26 + $0x98] sm:$0xff]  ;;  %s432_s26 = scalar_select %p431_p13, %s1902_s8, 3 }
  0x47   : > { %1647 = vmatprep.subr.bf16.mxu1 %v1646_v51  ;;  %v1393_v22 = vld [vmem:[%s2418_s2] ss:$0 sm:$0xff] }
  0x48   : > { %1617 = vmatpush3.bf16.msra.mxu0 %v1616_v55  ;;  %s1392_s28 = sshll.u32 %s432_s26, 3  ;;  %s1411_s26 = sshll.u32 %s1902_s8, 6 }
  0x49   : > { %1651 = vmatprep.subr.bf16.mxu0 %v1650_v57  ;;  %s434_s12 = scalar_lea.vmem %s2425_s9, %s1392_s28  ;;  %s2373_s14 = scalar_lea.hbm %s2426_s10, %s1411_s26 }
  0x4a   : > { %1649 = vmatpush3.bf16.msra.mxu1 %v1648_v56 }
  0x4b   : > { %613 = vmatmul.mubr.f32.vlgmr.msra.gmra.mrb[0].mxu0 %v436_v60 }
  0x4c   : > { %1653 = vmatpush3.bf16.msra.mxu0 %v1650_v57  ;;  %617 = vmatprep.mubr.f32.mxu0 %v442_v63 }
  0x4d   : > { %698 = vmatmul.mubr.f32.vlgmr.msra.gmra.mrb[0].mxu1 %v438_v61  ;;  %1655 = vmatprep.subr.bf16.mxu0 %v1654_v62 }
  0x4e   : > { %702 = vmatprep.mubr.f32.mxu1 %v444_v2 }
  0x4f   : > { %618 = vmatmul.mubr.f32.gmra.mrb[2].mxu0 %v441_v3 }
  0x50   : > { %1657 = vmatpush3.bf16.msra.mxu0 %v1654_v62  ;;  %622 = vmatprep.mubr.f32.mxu0 %v447_v6 }
  0x51   : > { %703 = vmatmul.mubr.f32.gmra.mrb[2].mxu1 %v443_v4  ;;  %1659 = vmatprep.subr.bf16.mxu0 %v1658_v5 }
  0x52   : > { %707 = vmatprep.mubr.f32.mxu1 %v449_v9 }
  0x53   : > { %623 = vmatmul.mubr.f32.gmra.mrb[4].mxu0 %v446_v10 }
  0x54   : > { %1661 = vmatpush3.bf16.msra.mxu0 %v1658_v5  ;;  %627 = vmatprep.mubr.f32.mxu0 %v452_v13 }
  0x55   : > { %708 = vmatmul.mubr.f32.gmra.mrb[4].mxu1 %v448_v11  ;;  %1663 = vmatprep.subr.bf16.mxu0 %v1662_v12 }
  0x56   : > { %712 = vmatprep.mubr.f32.mxu1 %v454_v14 }
  0x57   : > { %628 = vmatmul.mubr.f32.gmra.mrb[6].mxu0 %v451_v15 }
  0x58   : > { %1665 = vmatpush3.bf16.msra.mxu0 %v1662_v12  ;;  %1548 = vmatprep.mubr.msk.f32.mxu0 %vm535_vm0, %v440_v17 }
  0x59   : > { %713 = vmatmul.mubr.f32.gmra.mrb[6].mxu1 %v453_v16 }
  0x5b   : > { %1549 = vmatmul.mubr.msk.f32.vlgmr.msra.gmra.mrb[8].mxu0 %vm535_vm0, %v445_v18 }
  0x5c   : > { %1551 = vmatprep.mubr.msk.f32.mxu0 %vm535_vm0, %v450_v19 }
  0x5f   : > { %1552 = vmatmul.mubr.msk.f32.gmra.mrb[10].mxu0 %vm535_vm0, %v455_v20 }
 0x11e   : > { %v1446_v21 = vpop.f32.mrb[0].mxu0 }
 0x11f   : > { %v1447_v23 = vpop.f32.mrb[1].mxu0 }
 0x120   : > { %v1490_v24 = vpop.f32.mrb[0].mxu1  ;;  %v1448_v25 = vadd.f32 %v1447_v23, %v1446_v21 }
 0x121   : > { %v1491_v26 = vpop.f32.mrb[1].mxu1 }
 0x122   : > { %v1492_v27 = vadd.f32 %v1491_v26, %v1490_v24  ;;  %v615_v28 = vadd.f32 %v1448_v25, %v1393_v22  ;;  %v1449_v29 = vpop.f32.mrb[2].mxu0 }
 0x123   : > { %v1450_v30 = vpop.f32.mrb[3].mxu0 }
 0x124   : > { %v1493_v31 = vpop.f32.mrb[2].mxu1  ;;  %v1451_v32 = vadd.f32 %v1450_v30, %v1449_v29  ;;  %v700_v34 = vadd.f32 %v1492_v27, %v615_v28 }
 0x125   : > { %v1494_v33 = vpop.f32.mrb[3].mxu1 }
 0x126   : > { %v1495_v35 = vadd.f32 %v1494_v33, %v1493_v31  ;;  %v620_v36 = vadd.f32 %v1451_v32, %v1393_v22  ;;  %v1452_v37 = vpop.f32.mrb[4].mxu0  ;;  %v2259_v32 = vld [vmem:[%s434_s12] sm:$0xff] }
 0x127   : > { %v1453_v38 = vpop.f32.mrb[5].mxu0 }
 0x128   : > { %v1496_v39 = vpop.f32.mrb[4].mxu1  ;;  %v1454_v40 = vadd.f32 %v1453_v38, %v1452_v37  ;;  %v705_v42 = vadd.f32 %v1495_v35, %v620_v36  ;;  %v871_v36 = vld [vmem:[%s2419_s3] sm:$0xff]  ;;  %v872_v37 = vld [vmem:[%s2419_s3 + $0x8] sm:$0xff]  ;;  %v873_v38 = vld [vmem:[%s2419_s3 + $0x10] sm:$0xff] }
 0x129   : > { %v1497_v41 = vpop.f32.mrb[5].mxu1 }
 0x12a   : > { %v1498_v43 = vadd.f32 %v1497_v41, %v1496_v39  ;;  %v625_v44 = vadd.f32 %v1454_v40, %v1393_v22  ;;  %v1455_v45 = vpop.f32.mrb[6].mxu0  ;;  %v1666_v39 = vpack.c.bf16 %v872_v37, %v871_v36  ;;  %v874_v40 = vld [vmem:[%s2419_s3 + $0x18] sm:$0xff] }
 0x12b   : > { %v1456_v46 = vpop.f32.mrb[7].mxu0  ;;  %v1670_v41 = vpack.c.bf16 %v874_v40, %v873_v38 }
 0x12c   : > { %v1499_v47 = vpop.f32.mrb[6].mxu1  ;;  %v1457_v48 = vadd.f32 %v1456_v46, %v1455_v45  ;;  %v710_v50 = vadd.f32 %v1498_v43, %v625_v44  ;;  %v876_v43 = vld [vmem:[%s2419_s3 + $0x28] sm:$0xff]  ;;  %1667 = vmatprep.subr.bf16.mxu1 %v1666_v39  ;;  %v1817_v44 = vmov 1   ;;  %v877_v46 = vld [vmem:[%s2419_s3 + $0x30] sm:$0xff] }
 0x12d   : > { %v1500_v49 = vpop.f32.mrb[7].mxu1  ;;  %1669 = vmatpush3.bf16.msra.mxu1 %v1666_v39 }
 0x12e   : > { %v1501_v51 = vadd.f32 %v1500_v49, %v1499_v47  ;;  %v630_v52 = vadd.f32 %v1457_v48, %v1393_v22  ;;  %v1550_v53 = vpop.f32.mrb[8].mxu0  ;;  %v1815_v22 = vmov 0   ;;  %1671 = vmatprep.subr.bf16.mxu1 %v1670_v41  ;;  %v878_v47 = vld [vmem:[%s2419_s3 + $0x38] sm:$0xff] }
 0x12f   : > { %v2229_v54 = vadd.f32 %v1550_v53, %v705_v42  ;;  %v784_v55 = vpop.f32.mrb[9].mxu0  ;;  %1737 = vset.pattern.permute.xlu1 %v1815_v22  ;;  %v875_v42 = vld [vmem:[%s2419_s3 + $0x20] sm:$0xff]  ;;  %v1678_v48 = vpack.c.bf16 %v878_v47, %v877_v46  ;;  %v1053_v47 = vld [vmem:[%s2421_s5 + $0x8] sm:$0xff] }
 0x130   : > { %v2231_v56 = vadd.f32 %v784_v55, %v700_v34  ;;  %v715_v57 = vadd.f32 %v1501_v51, %v630_v52  ;;  %v1674_v45 = vpack.c.bf16 %v876_v43, %v875_v42  ;;  %v1819_v42 = vmov 3   ;;  %v1052_v46 = vld [vmem:[%s2421_s5] sm:$0xff] }
 0x131   : > { %v806_v0 = vsel %vm535_vm0, %v2229_v54, 0.0  ;;  %1673 = vmatpush3.bf16.msra.mxu1 %v1670_v41 }
 0x132   : > { %v1553_v58 = vpop.f32.mrb[10].mxu0  ;;  %v803_v59 = vsel %vm535_vm0, %v2231_v56, 0.0  ;;  %1675 = vmatprep.subr.bf16.mxu1 %v1674_v45 }
 0x133   : > { %v2235_v60 = vadd.f32 %v1553_v58, %v715_v57  ;;  %v794_v61 = vpop.f32.mrb[11].mxu0  ;;  %804 = vadd.xlane.f32.xlu0 %v803_v59 }
 0x134   : > { %v2237_v62 = vadd.f32 %v794_v61, %v710_v50 }
 0x135   : > { %v812_v1 = vsel %vm535_vm0, %v2235_v60, 0.0  ;;  %1677 = vmatpush3.bf16.msra.mxu1 %v1674_v45 }
 0x136   : > { %v809_v63 = vsel %vm535_vm0, %v2237_v62, 0.0  ;;  %1679 = vmatprep.subr.bf16.mxu1 %v1678_v48 }
 0x137   : > { %810 = vadd.xlane.f32.xlu1 %v809_v63  ;;  %807 = vadd.xlane.f32.xlu0 %v806_v0 }
 0x139   : > { %1681 = vmatpush3.bf16.msra.mxu1 %v1678_v48  ;;  %v1682_v48 = vpack.c.bf16 %v1053_v47, %v1052_v46 }
 0x13b   : > { %813 = vadd.xlane.f32.xlu1 %v812_v1  ;;  %1683 = vmatprep.subr.bf16.mxu0 %v1682_v48 }
 0x13c   : > { %1686 = vmatprep.subr.bf16.mxu1 %v1682_v48  ;;  %1685 = vmatpush3.bf16.msra.mxu0 %v1682_v48 }
 0x1c0   : > { %v805_v2 = vpop.xlane.xlu0 %804 }
 0x1c4   : > { %v811_v3 = vpop.xlane.xlu1 %810  ;;  %v808_v4 = vpop.xlane.xlu0 %807 }
 0x1c5   : > { %v815_v5 = vadd.f32 %v808_v4, %v805_v2 }
 0x1c7   : > { %v816_v6 = vadd.f32 %v815_v5, %v811_v3 }
 0x1c8   : > { %v814_v7 = vpop.xlane.xlu1 %813 }
 0x1c9   : > { %v817_v8 = vadd.f32 %v816_v6, %v814_v7 }
 0x1cb   : > { %v819_v9 = vmul.f32 0.00390625, %v817_v8 }
 0x1cd   : > { %v821_v10 = vsub.f32 %v2229_v54, %v819_v9  ;;  %v820_v11 = vsub.f32 %v2231_v56, %v819_v9  ;;  %v823_v12 = vsub.f32 %v2235_v60, %v819_v9  ;;  %v822_v13 = vsub.f32 %v2237_v62, %v819_v9 }
 0x1cf   : > { %v825_v14 = vmul.f32 %v821_v10, %v821_v10  ;;  %v824_v15 = vmul.f32 %v820_v11, %v820_v11  ;;  %v827_v18 = vmul.f32 %v823_v12, %v823_v12  ;;  %v826_v19 = vmul.f32 %v822_v13, %v822_v13 }
 0x1d1   : > { %v831_v16 = vsel %vm535_vm0, %v825_v14, 0.0  ;;  %v828_v17 = vsel %vm535_vm0, %v824_v15, 0.0  ;;  %v837_v20 = vsel %vm535_vm0, %v827_v18, 0.0  ;;  %v834_v21 = vsel %vm535_vm0, %v826_v19, 0.0 }
 0x1d2   : > { %832 = vadd.xlane.f32.xlu1 %v831_v16  ;;  %829 = vadd.xlane.f32.xlu0 %v828_v17 }
 0x1d6   : > { %838 = vadd.xlane.f32.xlu1 %v837_v20  ;;  %835 = vadd.xlane.f32.xlu0 %v834_v21 }
 0x25f   : > { %v833_v23 = vpop.xlane.xlu1 %832  ;;  %v830_v24 = vpop.xlane.xlu0 %829 }
 0x260   : > { %v840_v25 = vadd.f32 %v833_v23, %v830_v24 }
 0x263   : > { %v836_v26 = vpop.xlane.xlu0 %835  ;;  %v839_v28 = vpop.xlane.xlu1 %838 }
 0x264   : > { %v841_v27 = vadd.f32 %v840_v25, %v836_v26 }
 0x266   : > { %v842_v29 = vadd.f32 %v841_v27, %v839_v28 }
 0x268   : > { %v843_v30 = vmul.f32 0.00390625, %v842_v29 }
 0x26a   : > { %v844_v31 = vadd.f32 1e-05, %v843_v30 }
 0x26c   : > { %1745 = vrsqrt.f32 %v844_v31  ;;  %v1818_v31 = vmov 2  }
 0x26d   : > { %1739 = vset.pattern.permute.xlu0 %v1818_v31  ;;  %v1820_v31 = vmov 4  }
 0x276   : > { %v1746_v33 = vpop.eup %1745 }
 0x277   : > { %v846_v34 = vmul.f32 %v1746_v33, %v2259_v32 }
 0x279   : > { %855 = vperm.xlu1 %1737, %v846_v34   ;;  %v847_v35 = vmul.f32 %v846_v34, %v819_v9 }
 0x27b   : > { %849 = vrot.lane.b32.xlu0 %v847_v35, %s1816_s30 }
 0x27d   : > { %1738 = vset.pattern.permute.xlu1 %v1817_v44 }
 0x2ed   : > { %v850_v49 = vpop.permute.xlu0 %849 }
 0x2ee   : > { %v852_v50 = vsub.f32 %v2259_v32, %v850_v49 }
 0x2f0   : > { %864 = vperm.xlu1 %1738, %v852_v50  }
 0x2f4   : > { %1740 = vset.pattern.permute.xlu1 %v1819_v42 }
 0x2f8   : > { %v856_v51 = vpop.permute.xlu1 %855 }
 0x2f9   : > { %v858_v52 = vmul.f32 %v856_v51, %v2231_v56  ;;  %v859_v53 = vmul.f32 %v856_v51, %v2229_v54  ;;  %v860_v57 = vmul.f32 %v856_v51, %v2237_v62  ;;  %v861_v63 = vmul.f32 %v856_v51, %v2235_v60  ;;  %v1398_v54 = vld [vmem:[%s2420_s4] ss:$0 sm:$0xff] }
 0x36f   : > { %v865_v55 = vpop.permute.xlu1 %864 }
 0x370   : > { %v867_v58 = vadd.f32 %v865_v55, %v858_v52  ;;  %v868_v59 = vadd.f32 %v865_v55, %v859_v53  ;;  %v869_v61 = vadd.f32 %v865_v55, %v860_v57  ;;  %v870_v0 = vadd.f32 %v865_v55, %v861_v63 }
 0x372   : > { %1570 = vmatprep.mubr.msk.f32.mxu1 %vm535_vm0, %v867_v58 }
 0x373   : > { %1571 = vmatmul.mubr.msk.f32.vlgmr.msra.gmra.mrb[8].mxu1 %vm535_vm0, %v868_v59 }
 0x374   : > { %1573 = vmatprep.mubr.msk.f32.mxu1 %vm535_vm0, %v869_v61  ;;  %1687 = vmatpush3.bf16.msra.mxu1 %v1682_v48 }
 0x377   : > { %1574 = vmatmul.mubr.msk.f32.gmra.mrb[10].mxu1 %vm535_vm0, %v870_v0 }
 0x446   : > { %v1572_v56 = vpop.f32.mrb[8].mxu1 }
 0x447   : > { %v2299_v62 = vadd.f32 %v1572_v56, %v1398_v54  ;;  %v964_v1 = vpop.f32.mrb[9].mxu1 }
 0x448   : > { %v2301_v2 = vadd.f32 %v1398_v54, %v964_v1 }
 0x449   : > { %v987_v60 = vsel %vm983_vm1, %v2299_v62, 0.0 }
 0x44a   : > { %988 = vadd.xlane.f32.xlu0 %v987_v60  ;;  %v1575_v3 = vpop.f32.mrb[10].mxu1  ;;  %v984_v4 = vsel %vm983_vm1, %v2301_v2, 0.0 }
 0x44b   : > { %v974_v5 = vpop.f32.mrb[11].mxu1  ;;  %985 = vadd.xlane.f32.xlu1 %v984_v4  ;;  %v2309_v7 = vadd.f32 %v1575_v3, %v1398_v54 }
 0x44c   : > { %v2307_v6 = vadd.f32 %v1398_v54, %v974_v5  ;;  %v1403_v54 = vld [vmem:[%s2422_s6] ss:$0 sm:$0xff] }
 0x44d   : > { %v993_v9 = vsel %vm983_vm1, %v2309_v7, 0.0 }
 0x44e   : > { %v990_v8 = vsel %vm983_vm1, %v2307_v6, 0.0 }
 0x44f   : > { %991 = vadd.xlane.f32.xlu0 %v990_v8 }
 0x453   : > { %994 = vadd.xlane.f32.xlu0 %v993_v9 }
 0x4d7   : > { %v989_v10 = vpop.xlane.xlu0 %988 }
 0x4d8   : > { %v986_v11 = vpop.xlane.xlu1 %985 }
 0x4d9   : > { %v996_v13 = vadd.f32 %v989_v10, %v986_v11 }
 0x4dc   : > { %v992_v12 = vpop.xlane.xlu0 %991 }
 0x4dd   : > { %v997_v14 = vadd.f32 %v996_v13, %v992_v12 }
 0x4e0   : > { %v995_v15 = vpop.xlane.xlu0 %994 }
 0x4e1   : > { %v998_v16 = vadd.f32 %v997_v14, %v995_v15 }
 0x4e3   : > { %v1000_v17 = vmul.f32 0.015625, %v998_v16 }
 0x4e5   : > { %v1002_v18 = vsub.f32 %v2299_v62, %v1000_v17  ;;  %v1001_v19 = vsub.f32 %v2301_v2, %v1000_v17  ;;  %v1004_v20 = vsub.f32 %v2309_v7, %v1000_v17  ;;  %v1003_v21 = vsub.f32 %v2307_v6, %v1000_v17 }
 0x4e7   : > { %v1006_v23 = vmul.f32 %v1002_v18, %v1002_v18  ;;  %v1005_v24 = vmul.f32 %v1001_v19, %v1001_v19  ;;  %v1008_v27 = vmul.f32 %v1004_v20, %v1004_v20  ;;  %v1007_v28 = vmul.f32 %v1003_v21, %v1003_v21 }
 0x4e9   : > { %v1012_v25 = vsel %vm983_vm1, %v1006_v23, 0.0  ;;  %v1009_v26 = vsel %vm983_vm1, %v1005_v24, 0.0  ;;  %v1018_v29 = vsel %vm983_vm1, %v1008_v27, 0.0  ;;  %v1015_v30 = vsel %vm983_vm1, %v1007_v28, 0.0 }
 0x4ea   : > { %1013 = vadd.xlane.f32.xlu0 %v1012_v25  ;;  %1010 = vadd.xlane.f32.xlu1 %v1009_v26 }
 0x4ee   : > { %1019 = vadd.xlane.f32.xlu0 %v1018_v29  ;;  %1016 = vadd.xlane.f32.xlu1 %v1015_v30 }
 0x577   : > { %v1014_v33 = vpop.xlane.xlu0 %1013  ;;  %v1011_v34 = vpop.xlane.xlu1 %1010 }
 0x578   : > { %v1021_v35 = vadd.f32 %v1014_v33, %v1011_v34 }
 0x57b   : > { %v1017_v36 = vpop.xlane.xlu1 %1016  ;;  %v1020_v38 = vpop.xlane.xlu0 %1019 }
 0x57c   : > { %v1022_v37 = vadd.f32 %v1021_v35, %v1017_v36 }
 0x57e   : > { %v1023_v39 = vadd.f32 %v1022_v37, %v1020_v38 }
 0x580   : > { %v1024_v40 = vmul.f32 0.015625, %v1023_v39 }
 0x582   : > { %v1025_v41 = vadd.f32 1e-05, %v1024_v40 }
 0x584   : > { %1747 = vrsqrt.f32 %v1025_v41 }
 0x58e   : > { %v1748_v43 = vpop.eup %1747 }
 0x58f   : > { %v1027_v44 = vmul.f32 %v1748_v43, %v2259_v32 }
 0x591   : > { %1036 = vperm.xlu0 %1739, %v1027_v44   ;;  %v1028_v45 = vmul.f32 %v1027_v44, %v1000_v17 }
 0x593   : > { %1030 = vrot.lane.b32.xlu1 %v1028_v45, %s1816_s30  ;;  %v1821_v45 = vmov 5  }
 0x595   : > { %1744 = vset.pattern.permute.xlu0 %v1815_v22 }
 0x605   : > { %v1031_v49 = vpop.permute.xlu1 %1030 }
 0x606   : > { %v1033_v50 = vsub.f32 %v2259_v32, %v1031_v49 }
 0x608   : > { %1045 = vperm.xlu1 %1740, %v1033_v50  }
 0x60c   : > { %1741 = vset.pattern.permute.xlu1 %v1820_v31 }
 0x610   : > { %v1037_v51 = vpop.permute.xlu0 %1036 }
 0x611   : > { %v1039_v52 = vmul.f32 %v1037_v51, %v2301_v2  ;;  %v1040_v53 = vmul.f32 %v1037_v51, %v2299_v62  ;;  %v1041_v55 = vmul.f32 %v1037_v51, %v2307_v6  ;;  %v1042_v57 = vmul.f32 %v1037_v51, %v2309_v7 }
 0x687   : > { %v1046_v58 = vpop.permute.xlu1 %1045 }
 0x688   : > { %v1048_v59 = vadd.f32 %v1046_v58, %v1039_v52  ;;  %v1049_v61 = vadd.f32 %v1046_v58, %v1040_v53  ;;  %v1050_v63 = vadd.f32 %v1046_v58, %v1041_v55  ;;  %v1051_v0 = vadd.f32 %v1046_v58, %v1042_v57  ;;  %v1408_v53 = vld [vmem:[%s2423_s7] ss:$0 sm:$0xff] }
 0x68a   : > { %1580 = vmatprep.mubr.msk.f32.mxu0 %vm983_vm1, %v1048_v59  ;;  %1583 = vmatprep.mubr.msk.f32.mxu1 %vm983_vm1, %v1050_v63 }
 0x68b   : > { %1581 = vmatmul.mubr.msk.f32.vlgmr.msra.gmra.mrb[12].mxu0 %vm983_vm1, %v1049_v61  ;;  %1584 = vmatmul.mubr.msk.f32.vlgmr.msra.gmra.mrb[12].mxu1 %vm983_vm1, %v1051_v0 }
 0x75e   : > { %v1582_v56 = vpop.f32.mrb[12].mxu0  ;;  %v1585_v62 = vpop.f32.mrb[12].mxu1 }
 0x75f   : > { %v2344_v1 = vadd.f32 %v1582_v56, %v1403_v54  ;;  %v1139_v2 = vpop.f32.mrb[13].mxu0  ;;  %v1149_v60 = vpop.f32.mrb[13].mxu1  ;;  %v1155_v7 = vadd.f32 %v1585_v62, %v1403_v54 }
 0x760   : > { %v1140_v3 = vadd.f32 %v1403_v54, %v1139_v2  ;;  %v1150_v5 = vadd.f32 %v1403_v54, %v1149_v60  ;;  %v1409_v2 = vld [vmem:[#allocation2] ss:$0 sm:$0xff]  ;;  %v1268_v60 = vlaneseq }
 0x761   : > { %v1162_v4 = vsel %vm1158_vm2, %v2344_v1, 0.0  ;;  %v1168_v9 = vsel %vm1158_vm2, %v1155_v7, 0.0 }
 0x762   : > { %1163 = vadd.xlane.f32.xlu0 %v1162_v4  ;;  %v1159_v6 = vsel %vm1158_vm2, %v1140_v3, 0.0  ;;  %v1165_v8 = vsel %vm1158_vm2, %v1150_v5, 0.0  ;;  %v1271_v4 = vshrl.u32 %v1268_v60, 7 }
 0x763   : > { %1160 = vadd.xlane.f32.xlu1 %v1159_v6 }
 0x767   : > { %1166 = vadd.xlane.f32.xlu1 %v1165_v8 }
 0x76b   : > { %1169 = vadd.xlane.f32.xlu1 %v1168_v9 }
 0x7ef   : > { %v1164_v11 = vpop.xlane.xlu0 %1163 }
 0x7f0   : > { %v1161_v10 = vpop.xlane.xlu1 %1160 }
 0x7f1   : > { %v1171_v13 = vadd.f32 %v1164_v11, %v1161_v10 }
 0x7f4   : > { %v1167_v12 = vpop.xlane.xlu1 %1166 }
 0x7f5   : > { %v1172_v14 = vadd.f32 %v1171_v13, %v1167_v12 }
 0x7f8   : > { %v1170_v15 = vpop.xlane.xlu1 %1169 }
 0x7f9   : > { %v1173_v16 = vadd.f32 %v1172_v14, %v1170_v15 }
 0x7fb   : > { %v1175_v17 = vmul.f32 0.0625, %v1173_v16 }
 0x7fd   : > { %v1176_v18 = vsub.f32 %v1140_v3, %v1175_v17  ;;  %v1177_v19 = vsub.f32 %v2344_v1, %v1175_v17  ;;  %v1178_v24 = vsub.f32 %v1150_v5, %v1175_v17  ;;  %v1179_v27 = vsub.f32 %v1155_v7, %v1175_v17 }
 0x7ff   : > { %v1180_v20 = vmul.f32 %v1176_v18, %v1176_v18  ;;  %v1181_v23 = vmul.f32 %v1177_v19, %v1177_v19  ;;  %v1182_v26 = vmul.f32 %v1178_v24, %v1178_v24  ;;  %v1183_v29 = vmul.f32 %v1179_v27, %v1179_v27 }
 0x801   : > { %v1184_v21 = vsel %vm1158_vm2, %v1180_v20, 0.0  ;;  %v1187_v25 = vsel %vm1158_vm2, %v1181_v23, 0.0  ;;  %v1190_v28 = vsel %vm1158_vm2, %v1182_v26, 0.0  ;;  %v1193_v30 = vsel %vm1158_vm2, %v1183_v29, 0.0 }
 0x802   : > { %1185 = vadd.xlane.f32.xlu1 %v1184_v21 }
 0x806   : > { %1188 = vadd.xlane.f32.xlu1 %v1187_v25 }
 0x80a   : > { %1191 = vadd.xlane.f32.xlu1 %v1190_v28 }
 0x80e   : > { %1194 = vadd.xlane.f32.xlu1 %v1193_v30 }
 0x88f   : > { %v1186_v33 = vpop.xlane.xlu1 %1185 }
 0x893   : > { %v1189_v34 = vpop.xlane.xlu1 %1188 }
 0x894   : > { %v1196_v36 = vadd.f32 %v1189_v34, %v1186_v33 }
 0x897   : > { %v1192_v35 = vpop.xlane.xlu1 %1191 }
 0x898   : > { %v1197_v37 = vadd.f32 %v1196_v36, %v1192_v35 }
 0x89b   : > { %v1195_v38 = vpop.xlane.xlu1 %1194 }
 0x89c   : > { %v1198_v39 = vadd.f32 %v1197_v37, %v1195_v38 }
 0x89e   : > { %v1199_v40 = vmul.f32 0.0625, %v1198_v39 }
 0x8a0   : > { %v1200_v41 = vadd.f32 1e-05, %v1199_v40 }
 0x8a2   : > { %1749 = vrsqrt.f32 %v1200_v41 }
 0x8ac   : > { %v1750_v42 = vpop.eup %1749 }
 0x8ad   : > { %v1202_v43 = vmul.f32 %v1750_v42, %v2259_v32 }
 0x8af   : > { %1211 = vperm.xlu1 %1741, %v1202_v43   ;;  %v1203_v44 = vmul.f32 %v1202_v43, %v1175_v17 }
 0x8b1   : > { %1205 = vrot.lane.b32.xlu0 %v1203_v44, %s1816_s30  ;;  %s1391_s30 = sshll.u32 %s2080_s27, 2 }
 0x8b2   : > { %s430_s28 = scalar_lea.vmem [#allocation4], %s1391_s30 }
 0x8b3   : > { %1742 = vset.pattern.permute.xlu1 %v1821_v45  ;;  %s1309_s11 = sshll.u32 %s430_s28, 4  ;;  %s2375_s11 = int_to_ptr.vmem [resolvable:$true] %s1309_s11 }
 0x8b4   : > { %s1751_s8 = scalar_lea.vmem %s2375_s11, 64  ;;  %p1758_p3 = scmp.lt.s32.totalorder %s2375_s11, %s1756_s21 }
 0x8b5   : > { %p1752_p0 = scmp.ne.s32.totalorder %s2375_s11, %s1751_s8  ;;  %p1759_p4 = scmp.lt.s32.totalorder %s1757_s22, %s1751_s8 }
 0x8b7   : > { %p1753_p1 = pnand %p1752_p0, %p1920_p6  ;;  %p1760_p5 = por %p1759_p4, %p1758_p3 }
 0x8b9   : > { %p1754_p2 = pneg %p1753_p1 }
 0x8bb   : > { %p1761_p7 = pnand %p1760_p5, %p1754_p2 }
 0x923   : > { %v1206_v46 = vpop.permute.xlu0 %1205 }
 0x924   : > { %v1208_v47 = vsub.f32 %v2259_v32, %v1206_v46 }
 0x926   : > { %1220 = vperm.xlu1 %1742, %v1208_v47  }
 0x92a   : > { %1743 = vset.pattern.permute.xlu1 %v1815_v22 }
 0x92e   : > { %v1212_v48 = vpop.permute.xlu1 %1211 }
 0x92f   : > { %v1214_v49 = vmul.f32 %v1212_v48, %v1140_v3  ;;  %v1215_v50 = vmul.f32 %v1212_v48, %v2344_v1  ;;  %v1216_v51 = vmul.f32 %v1212_v48, %v1150_v5  ;;  %v1217_v59 = vmul.f32 %v1212_v48, %v1155_v7 }
 0x930   : > { %v1269_v3 = vand.u32 127, %v1268_v60 }
 0x932   : > { %v1272_v7 = vsub.s32 %v1269_v3, %v1271_v4 }
 0x9a5   : > { %v1221_v52 = vpop.permute.xlu1 %1220 }
 0x9a6   : > { %v1224_v55 = vadd.f32 %v1221_v52, %v1215_v50  ;;  %v1223_v57 = vadd.f32 %v1221_v52, %v1214_v49  ;;  %v1225_v58 = vadd.f32 %v1221_v52, %v1216_v51  ;;  %v1226_v54 = vadd.f32 %v1221_v52, %v1217_v59 }
 0x9a8   : > { %v1235_v61 = vmul.f32 %v1408_v53, %v1224_v55  ;;  %v1234_v63 = vmul.f32 %v1408_v53, %v1223_v57  ;;  %v1236_v0 = vmul.f32 %v1408_v53, %v1225_v58  ;;  %v1237_v62 = vmul.f32 %v1408_v53, %v1226_v54 }
 0x9aa   : > { %v1241_v32 = vsel %vm1158_vm2, %v1235_v61, 0.0  ;;  %v1238_v22 = vsel %vm1158_vm2, %v1234_v63, 0.0  ;;  %v1244_v56 = vsel %vm1158_vm2, %v1236_v0, 0.0  ;;  %v1247_v1 = vsel %vm1158_vm2, %v1237_v62, 0.0 }
 0x9ab   : > { %1242 = vadd.xlane.f32.xlu1 %v1241_v32  ;;  %1239 = vadd.xlane.f32.xlu0 %v1238_v22 }
 0x9af   : > { %1245 = vadd.xlane.f32.xlu0 %v1244_v56 }
 0x9b3   : > { %1248 = vadd.xlane.f32.xlu0 %v1247_v1 }
 0x9bc   : > { %1257 = vperm.xlu1 %1743, %v1409_v2  }
 0xa38   : > { %v1243_v5 = vpop.xlane.xlu1 %1242  ;;  %v1240_v6 = vpop.xlane.xlu0 %1239 }
 0xa3c   : > { %v1258_v8 = vpop.permute.xlu1 %1257  ;;  %v1246_v9 = vpop.xlane.xlu0 %1245 }
 0xa3d   : > { %v1260_v10 = vadd.f32 %v1258_v8, %v1240_v6  ;;  %v1261_v11 = vadd.f32 %v1258_v8, %v1243_v5  ;;  %v1262_v12 = vadd.f32 %v1258_v8, %v1246_v9 }
 0xa3f   : > { %v1273_v13 = vrot.slane %v1260_v10, %v1272_v7  ;;  %v1277_v14 = vrot.slane %v1261_v11, %v1272_v7  ;;  %v1281_v15 = vrot.slane %v1262_v12, %v1272_v7 }
 0xa40   : > { %v1249_v16 = vpop.xlane.xlu0 %1248 }
 0xa41   : > { %v1287_v17 = vsel %vm1286_vm3, %v1277_v14, %v1273_v13  ;;  %v1263_v18 = vadd.f32 %v1258_v8, %v1249_v16 }
 0xa42   : > { %v1289_v20 = vsel %vm1288_vm4, %v1281_v15, %v1287_v17 }
 0xa43   : > { %v1285_v19 = vrot.slane %v1263_v18, %v1272_v7 }
 0xa45   : > { %v1291_v21 = vsel %vm1290_vm5, %v1285_v19, %v1289_v20 }
 0xa46   : > { %1294 = vst.msk [vmem:[%s430_s28] sm:$0xf] %vm1293_vm6, %v1291_v21 }
 0xa47   : > { %1764 = shalt.err (!%p1761_p7)
}
 0xa48   : > { %s1765_s27 = scalar_lea.hbm %s2373_s14, 64  ;;  %s1769_s28 = scalar_lea.hbm %s2426_s10, 256 }
 0xa49   : > { %p1766_p9 = scmp.ne.s32.totalorder %s2373_s14, %s1765_s27  ;;  %p1770_p12 = scmp.lt.u32.totalorder %s2373_s14, %s2426_s10 }
 0xa4a   : > { %p1771_p13 = scmp.lt.u32.totalorder %s1769_s28, %s1765_s27  ;;  %p1773_p1 = scmp.lt.u32.totalorder %s1765_s27, %s2373_s14 }
 0xa4b   : > { %p1767_p10 = pnand %p1766_p9, %p1920_p6 }
 0xa4c   : > { %p1772_p0 = por %p1771_p13, %p1770_p12 }
 0xa4d   : > { %p1768_p11 = pneg %p1767_p10 }
 0xa4e   : > { %p1774_p2 = por %p1773_p1, %p1772_p0 }
 0xa50   : > { %p1775_p3 = pnand %p1774_p2, %p1768_p11 }
 0xa52   : > { %1778 = shalt.err (!%p1775_p3)
}
 0xa53   : > { %1691 = dma.vmem_to_hbm [thread:$0]  (%p1920_p6), %s2375_s11, 64, %s2373_s14, %s1296_s29  }
 0xa54 PF: > { %p1697_p4 = scmp.ge.s32.totalorder %s1813_s18, 2  ;;  %s1321_s8 = sand.u32 1, %s1801_s15  }
 0xa55   : > { %s1322_s19 = scalar_lea.sflag [#allocation5], %s1321_s8 }
 0xa56   : > { %p1694_p5 = pnand %p1697_p4, %p1924_p8 }
 0xa58   : > { %1796 = dma.done.wait (!%p1694_p5), %s1322_s19, 64  }
 0xa59   : > { %1798 = vsyncadd (!%p1694_p5), %s1322_s19, 4294967232  ;;  %p22_p7 = scmp.ge.s32.totalorder %s1906_s20, 6   ;;  %s2429_s15 = smov %s1805_s16 }
 0xa5a   : > { %s2430_s16 = smov %s1809_s17  ;;  %s2431_s17 = smov %s1918_s23 }
 0xa5b   : > { %s2432_s18 = smov %s1906_s20  ;;  %24 = sbr.rel (!%p22_p7) target bundleno = 6 (0x6), region = 126 }
 0xa62   :  { %1327 = vsyncpa [#allocation5], 1 }
 0xa63   :  { %1329 = vsyncpa [#allocation5 + $0x1], 1 }

</bundles_post_ra>
